<compile_context>
chip_gen: v6e
topology: v6e:2x2x1
jax: 0.10.0
libtpu: 0.0.40
codegen_flags: <defaults>
</compile_context>

<pallas_src>
import functools

import jax
import jax.numpy as jnp
from jax import lax
from jax.experimental import pallas as pl
from jax.experimental.pallas import tpu as pltpu


def _dwconv1d_roll_kernel(x_ref, w_ref, b_ref, o_ref, *, mult, pad):
    """Roll-based taps (odd K, lane-aligned L): no staging scratch, no halo stores.

    x_ref : (1, C_t_in, L)   unpadded input slab
    w_ref : (C_t, K)         per-output-channel taps
    b_ref : (C_t, 1)         bias
    o_ref : (1, C_t, L)      output slab (odd K -> L_out == L)
    """
    L = x_ref.shape[2]
    C_t, K = w_ref.shape

    x = x_ref[0].astype(jnp.float32)              # cast hoisted out of tap loop
    if mult > 1:
        # groups=C_in with a channel multiplier: output channel c reads c // mult.
        # TODO(synk): replace the sublane repeat with per-sub-weight accumulation
        # to avoid the XLU shuffle on the (rare) mult > 1 path.
        x = jnp.repeat(x, mult, axis=0)           # (C_t, L)

    wf = w_ref[...].astype(jnp.float32)           # cast once, not per tap
    bf = b_ref[...].astype(jnp.float32)
    lane = lax.broadcasted_iota(jnp.int32, (C_t, L), 1)

    acc = None
    for k in range(K):                            # K is small & static (unrolled)
        s = pad - k                               # logical shift of tap k
        if s == 0:
            tap = x
        else:
            # Lane rotation rides the XLU slot; only the wrapped boundary lanes
            # (the F.pad halo) need masking.
            tap = pltpu.roll(x, shift=s % L, axis=1)
            if s > 0:
                tap = jnp.where(lane >= s, tap, 0.0)
            else:
                tap = jnp.where(lane < L + s, tap, 0.0)
        term = tap * wf[:, k:k + 1]
        acc = (term + bf) if acc is None else (acc + term)   # bias fused into tap 0

    o_ref[0] = acc.astype(o_ref.dtype)


def _dwconv1d_scratch_kernel(x_ref, w_ref, b_ref, o_ref, xp_ref, *, mult, pad, left):
    """Fallback (even K or non-lane-aligned L): lane-aligned staging scratch.

    xp_ref : (C_t, left + L + pad) f32 scratch; x is staged at lane offset `left`
             (a multiple of 128 -> dense aligned store), taps read from
             [left - pad + k : ...].
    """
    C_t = xp_ref.shape[0]
    K = w_ref.shape[1]
    L_out = o_ref.shape[2]
    L = x_ref.shape[2]

    x = x_ref[0].astype(jnp.float32)
    if mult > 1:
        x = jnp.repeat(x, mult, axis=0)           # TODO(synk): avoid sublane repeat.

    if pad > 0:
        # NOTE: halo zeros are rewritten every step (not gated on grid step 0)
        # because under megacore sharding each TensorCore has its own scratch and
        # only one of them would ever see grid index (0, 0).
        xp_ref[:, left - pad:left] = jnp.zeros((C_t, pad), jnp.float32)
        xp_ref[:, left + L:left + L + pad] = jnp.zeros((C_t, pad), jnp.float32)
    xp_ref[:, left:left + L] = x                  # lane-aligned dense store

    wf = w_ref[...].astype(jnp.float32)
    bf = b_ref[...].astype(jnp.float32)

    acc = None
    base = left - pad
    for k in range(K):                            # static, unrolled
        term = xp_ref[:, base + k:base + k + L_out] * wf[:, k:k + 1]
        acc = (term + bf) if acc is None else (acc + term)

    o_ref[0] = acc.astype(o_ref.dtype)


def _vmem_budget_bytes():
    """(per-block byte budget, vmem_limit_bytes) chosen per TPU generation."""
    vmem_phys = 64 * 1024 * 1024                  # conservative default (v7x-sized)
    try:
        info = pltpu.get_tpu_info()
        vmem_phys = int(getattr(info, "vmem_capacity_bytes", vmem_phys))
    except Exception:
        pass
    if vmem_phys >= 96 * 1024 * 1024:             # v5e / v6e: 128 MiB physical VMEM
        return 4 * 1024 * 1024, 64 * 1024 * 1024
    return 2 * 1024 * 1024, 32 * 1024 * 1024      # v7x: 64 MiB physical VMEM


def _pick_channel_tile(c_out, mult, row_bytes, block_budget, n_batch):
    """Output-channel tile: sublane-aligned (C_t and C_t // mult multiples of 8),
    sized to ~block_budget bytes per grid step, shrunk if the grid would be too
    small to keep both v7x TensorCores / the pipeline busy."""
    base = 8 * mult
    if c_out % base != 0:
        # TODO(synk): pad odd channel counts up to 8*mult instead of one full block.
        return c_out
    max_rows = max(base, block_budget // max(1, row_bytes))
    c_t = base
    while c_out % (2 * c_t) == 0 and 2 * c_t <= max_rows:
        c_t *= 2
    while n_batch * (c_out // c_t) < 8 and c_t > base:
        c_t //= 2
    return c_t


def depthwise_cnn(x, weight, bias, kernel):
    """Forward pass of DepthWiseCNN (F.pad(kernel//2) + Conv1d(groups=C_in)).

    x:      (N, C_in, L)   NCW layout (same as PyTorch)
    weight: (C_out, 1, K)  PyTorch depthwise Conv1d weight (groups = C_in)
    bias:   (C_out,)
    """
    N, C_in, L = x.shape
    C_out, _, K = weight.shape
    assert K == kernel
    assert C_out % C_in == 0
    mult = C_out // C_in

    pad = K // 2
    L_out = L + 2 * pad - K + 1      # == L for odd K, L + 1 for even K

    block_budget, vmem_limit = _vmem_budget_bytes()
    # Rough per-output-channel-row VMEM footprint of a grid step (input share,
    # f32 working copy, output) — only used to size the channel tile.
    row_bytes = x.dtype.itemsize * (L // mult + L_out) + 4 * (L + 2 * pad)
    C_t = _pick_channel_tile(C_out, mult, row_bytes, block_budget, N)
    C_t_in = C_t // mult
    n_cblk = C_out // C_t

    w2d = weight[:, 0, :]            # (C_out, K)
    b2d = bias[:, None]              # (C_out, 1)

    # Fast path: odd K (L_out == L) and lane-aligned L -> XLU lane-rotation taps.
    use_roll = (K % 2 == 1) and (pad < L) and (L % 128 == 0)
    if use_roll:
        kern = functools.partial(_dwconv1d_roll_kernel, mult=mult, pad=pad)
        scratch = []
    else:
        left = 0 if pad == 0 else pl.cdiv(pad, 128) * 128   # lane-aligned staging offset
        kern = functools.partial(_dwconv1d_scratch_kernel, mult=mult, pad=pad, left=left)
        scratch = [pltpu.VMEM((C_t, left + L + pad), jnp.float32)]

    out = pl.pallas_call(
        kern,
        out_shape=jax.ShapeDtypeStruct((N, C_out, L_out), x.dtype),
        grid_spec=pltpu.PrefetchScalarGridSpec(
            num_scalar_prefetch=0,
            # Batch is the fast (inner) axis so the weight / bias block indices
            # are unchanged across it and Pallas keeps them resident.
            grid=(n_cblk, N),
            in_specs=[
                pl.BlockSpec((1, C_t_in, L), lambda c, n: (n, c, 0)),
                pl.BlockSpec((C_t, K), lambda c, n: (c, 0)),
                pl.BlockSpec((C_t, 1), lambda c, n: (c, 0)),
            ],
            out_specs=pl.BlockSpec((1, C_t, L_out), lambda c, n: (n, c, 0)),
            scratch_shapes=scratch,
        ),
        compiler_params=pltpu.CompilerParams(
            # Both axes independent -> megacore sharding on v7x even when N == 1.
            dimension_semantics=("parallel", "parallel"),
            vmem_limit_bytes=vmem_limit,
        ),
    )(x, w2d, b2d)
    return out


def _reference(x, weight, bias, kernel):
    """Pure-JAX reference matching PyTorch F.pad + depthwise Conv1d."""
    pad = kernel // 2
    x_pad = jnp.pad(x, ((0, 0), (0, 0), (pad, pad)))
    C_in = x.shape[1]
    out = lax.conv_general_dilated(
        x_pad, weight, window_strides=(1,), padding="VALID",
        dimension_numbers=("NCH", "OIH", "NCH"), feature_group_count=C_in)
    return out + bias[None, :, None]


def _run_case(key, n, c_in, c_out, l, k):
    kx, kw, kb = jax.random.split(key, 3)
    x = jax.random.normal(kx, (n, c_in, l), dtype=jnp.float32)
    bound = 1.0 / jnp.sqrt(jnp.float32(k))   # groups=c_in => fan_in = 1 * k
    weight = jax.random.uniform(kw, (c_out, 1, k), minval=-bound, maxval=bound,
                                dtype=jnp.float32)
    bias = jax.random.uniform(kb, (c_out,), minval=-bound, maxval=bound,
                              dtype=jnp.float32)
    out = jax.block_until_ready(depthwise_cnn(x, weight, bias, k))
    ref = _reference(x, weight, bias, k)
    assert out.shape == ref.shape, (out.shape, ref.shape)
    assert jnp.allclose(out, ref, atol=1e-5, rtol=1e-5), f"mismatch (K={k}, L={l})"


if __name__ == "__main__":
    key = jax.random.PRNGKey(0)
    k1, k2, k3 = jax.random.split(key, 3)
    # Roll fast path: odd kernel, lane-aligned length.
    _run_case(k1, 2, 4, 4, 128, 3)
    # Scratch fallback: odd kernel, non-lane-aligned length.
    _run_case(k2, 2, 4, 4, 16, 3)
    # Scratch fallback: even kernel (output length L + 1, like PyTorch).
    _run_case(k3, 2, 4, 4, 16, 4)
    print("KERNEL_OK")
</pallas_src>

<mosaic_0001>
module attributes {stable_mosaic.version = 11 : i64} {
  func.func @_dwconv1d_roll_kernel(%arg0: i32, %arg1: i32, %arg2: memref<1x4x128xf32, #tpu.memory_space<vmem>>, %arg3: memref<4x3xf32, #tpu.memory_space<vmem>>, %arg4: memref<4x1xf32, #tpu.memory_space<vmem>>, %arg5: memref<1x4x128xf32, #tpu.memory_space<vmem>>) attributes {dimension_semantics = [#tpu.dimension_semantics<parallel>, #tpu.dimension_semantics<parallel>], iteration_bounds = array<i64: 1, 2>, scalar_prefetch = 0 : i64, scratch_operands = 0 : i64, tpu.core_type = #tpu.core_type<tc>, window_params = [{transform_indices = @transform_0, window_bounds = array<i64: 1, 4, 128>}, {transform_indices = @transform_1, window_bounds = array<i64: 4, 3>}, {transform_indices = @transform_2, window_bounds = array<i64: 4, 1>}, {transform_indices = @transform_3, window_bounds = array<i64: 1, 4, 128>}]} {
    %c0 = arith.constant 0 : index
    %c0_0 = arith.constant 0 : index
    %c0_1 = arith.constant 0 : index
    %0 = vector.load %arg2[%c0, %c0_0, %c0_1] : memref<1x4x128xf32, #tpu.memory_space<vmem>>, vector<1x4x128xf32>
    %1 = vector.shape_cast %0 : vector<1x4x128xf32> to vector<4x128xf32>
    %c0_2 = arith.constant 0 : index
    %c0_3 = arith.constant 0 : index
    %2 = vector.load %arg3[%c0_2, %c0_3] : memref<4x3xf32, #tpu.memory_space<vmem>>, vector<4x3xf32>
    %c0_4 = arith.constant 0 : index
    %c0_5 = arith.constant 0 : index
    %3 = vector.load %arg4[%c0_4, %c0_5] : memref<4x1xf32, #tpu.memory_space<vmem>>, vector<4x1xf32>
    %4 = tpu.iota {dimensions = array<i32: 1>} : vector<4x128xi32>
    %c1_i32 = arith.constant 1 : i32
    %5 = tpu.dynamic_rotate %1 by %c1_i32 dim 1 : vector<4x128xf32>, i32 -> vector<4x128xf32>
    %c1_i32_6 = arith.constant 1 : i32
    %6 = vector.broadcast %c1_i32_6 : i32 to vector<4x128xi32>
    %7 = arith.cmpi sge, %4, %6 : vector<4x128xi32>
    %cst = arith.constant 0.000000e+00 : f32
    %8 = vector.broadcast %cst : f32 to vector<4x128xf32>
    %9 = arith.select %7, %5, %8 : vector<4x128xi1>, vector<4x128xf32>
    %10 = vector.extract_strided_slice %2 {offsets = [0, 0], sizes = [4, 1], strides = [1, 1]} : vector<4x3xf32> to vector<4x1xf32>
    %11 = vector.broadcast %10 : vector<4x1xf32> to vector<4x128xf32>
    %12 = arith.mulf %9, %11 : vector<4x128xf32>
    %13 = vector.broadcast %3 : vector<4x1xf32> to vector<4x128xf32>
    %14 = arith.addf %12, %13 : vector<4x128xf32>
    %15 = vector.extract_strided_slice %2 {offsets = [0, 1], sizes = [4, 1], strides = [1, 1]} : vector<4x3xf32> to vector<4x1xf32>
    %16 = vector.broadcast %15 : vector<4x1xf32> to vector<4x128xf32>
    %17 = arith.mulf %1, %16 : vector<4x128xf32>
    %18 = arith.addf %14, %17 : vector<4x128xf32>
    %c127_i32 = arith.constant 127 : i32
    %19 = tpu.dynamic_rotate %1 by %c127_i32 dim 1 : vector<4x128xf32>, i32 -> vector<4x128xf32>
    %c127_i32_7 = arith.constant 127 : i32
    %20 = vector.broadcast %c127_i32_7 : i32 to vector<4x128xi32>
    %21 = arith.cmpi slt, %4, %20 : vector<4x128xi32>
    %cst_8 = arith.constant 0.000000e+00 : f32
    %22 = vector.broadcast %cst_8 : f32 to vector<4x128xf32>
    %23 = arith.select %21, %19, %22 : vector<4x128xi1>, vector<4x128xf32>
    %24 = vector.extract_strided_slice %2 {offsets = [0, 2], sizes = [4, 1], strides = [1, 1]} : vector<4x3xf32> to vector<4x1xf32>
    %25 = vector.broadcast %24 : vector<4x1xf32> to vector<4x128xf32>
    %26 = arith.mulf %23, %25 : vector<4x128xf32>
    %27 = arith.addf %18, %26 : vector<4x128xf32>
    %c0_9 = arith.constant 0 : index
    %c0_10 = arith.constant 0 : index
    %c0_11 = arith.constant 0 : index
    %28 = vector.load %arg5[%c0_9, %c0_10, %c0_11] : memref<1x4x128xf32, #tpu.memory_space<vmem>>, vector<1x4x128xf32>
    %29 = vector.shape_cast %28 : vector<1x4x128xf32> to vector<4x128xf32>
    %30 = vector.shape_cast %27 : vector<4x128xf32> to vector<1x4x128xf32>
    tpu.vector_store %arg5[%c0_9, %c0_10, %c0_11], %30 {strides = array<i32>} : memref<1x4x128xf32, #tpu.memory_space<vmem>>, vector<1x4x128xf32>,
    return
  }
  func.func @transform_0(%arg0: i32, %arg1: i32) -> (i32, i32, i32) {
    %c0_i32 = arith.constant 0 : i32
    %c0_i32_0 = arith.constant 0 : i32
    return %arg1, %arg0, %c0_i32 : i32, i32, i32
  }
  func.func @transform_1(%arg0: i32, %arg1: i32) -> (i32, i32) {
    %c0_i32 = arith.constant 0 : i32
    %c0_i32_0 = arith.constant 0 : i32
    return %arg0, %c0_i32 : i32, i32
  }
  func.func @transform_2(%arg0: i32, %arg1: i32) -> (i32, i32) {
    %c0_i32 = arith.constant 0 : i32
    %c0_i32_0 = arith.constant 0 : i32
    return %arg0, %c0_i32 : i32, i32
  }
  func.func @transform_3(%arg0: i32, %arg1: i32) -> (i32, i32, i32) {
    %c0_i32 = arith.constant 0 : i32
    %c0_i32_0 = arith.constant 0 : i32
    return %arg1, %arg0, %c0_i32 : i32, i32, i32
  }
}

</mosaic_0001>

<bundles_post_ra>
// kernel: tpu_custom_call.1
= control target key start
LH: loop header
LB: loop body
LE: loop exit
PB: predicated region body
PF: predicated region fallthrough
CT: control target
= control target key end

     0   :  { %8 = vsyncpa [#allocation3], 0  ;;  %s766_s0 = inlined_call_operand.hbm [shape: f32[2,4,128], index: 0, kind: input, shape index: {}]   ;;  %s767_s1 = inlined_call_operand.vmem [shape: f32[4,3], index: 1, kind: input, shape index: {}]   ;;  %s768_s2 = inlined_call_operand.vmem [shape: f32[4,1], index: 2, kind: input, shape index: {}]   ;;  %s769_s3 = inlined_call_operand.hbm [shape: f32[2,4,128], index: 3, kind: output, shape index: {}]  }
   0x1   :  { %10 = vsyncpa [#allocation3 + $0x1], 0 }
   0x2   :  { %11 = vsyncpa [#allocation4], 0 }
   0x3   :  { %13 = vsyncpa [#allocation4 + $0x1], 0  ;;  %s622_s12 = smov 0   ;;  %s624_s13 = smov 0  }
   0x4   :  { %s626_s14 = smov 0   ;;  %s628_s15 = smov 0  }
   0x5   :  { %s630_s16 = smov 0   ;;  %s632_s17 = smov 0  }
   0x6 LB: > { %s400_s18 = sadd.s32 4294967295, %s593_s17   ;;  %s401_s19 = sadd.s32 4294967294, %s593_s17   ;;  %s593_s17 = sphi %s632_s17, %s19_s17   ;;  %s589_s16 = sphi %s630_s16, %s781_s16   ;;  %s585_s15 = sphi %s628_s15, %s780_s15   ;;  %s581_s14 = sphi %s626_s14, %s779_s14   ;;  %s577_s13 = sphi %s624_s13, %s778_s13   ;;  %s573_s12 = sphi %s622_s12, %s777_s12  }
   0x7   : > { %s28_s20 = sadd.s32 1, %s589_s16  ;;  %s40_s21 = sadd.s32 1, %s581_s14 }
   0x8   : > { %p29_p0 = scmp.ge.s32.totalorder %s28_s20, 2  ;;  %p47_p1 = scmp.ne.s32.totalorder %s581_s14, %s577_s13 }
   0x9   : > { %p48_p2 = scmp.eq.s32.totalorder %s593_s17, 0  ;;  %p53_p3 = scmp.ne.s32.totalorder %s577_s13, %s573_s12 }
   0xa   : > { %s783_s20 = smov (%p29_p0, %s28_s20), 0  ;;  %p54_p5 = scmp.eq.s32.totalorder %s400_s18, 0 }
   0xb   : > { %p663_p4 = por %p48_p2, %p47_p1  ;;  %s35_s23 = ssub.s32 %s589_s16, %s783_s20 }
   0xc   : > { %p131_p6 = scmp.eq.s32.totalorder %s400_s18, 1  ;;  %p38_p7 = scmp.eq.s32.totalorder %s35_s23, 0 }
   0xd   : > { %p669_p8 = por %p54_p5, %p53_p3  ;;  %p137_p10 = scmp.eq.s32.totalorder %s401_s19, 1 }
   0xe   : > { %p673_p9 = por %p131_p6, %p47_p1  ;;  %p427_p13 = scmp.lt.s32.totalorder %s593_s17, 2 }
   0xf   : > { %s678_s26 = scalar_select %p38_p7, %s581_s14, %s40_s21  }
  0x10   : > { %p680_p11 = por %p137_p10, %p53_p3  ;;  %s171_s28 = sand.u32 1, %s581_s14  }
  0x11   : > { %s406_s29 = sshll.u32 %s171_s28, 2  ;;  %s407_s30 = sshll.u32 %s589_s16, 6 }
  0x12   : > { %s773_s27 = scalar_select %p680_p11, 1, 0 }
  0x13   : > { %s181_s6 = scalar_lea.hbm %s766_s0, %s407_s30  ;;  %s175_s7 = scalar_lea.vmem [#allocation2], %s406_s29 }
  0x14   : > { %s183_s8 = sshll.u32 %s175_s7, 4  ;;  %p693_p0 = pnand %p427_p13, %p663_p4  ;;  %s184_s8 = int_to_ptr.vmem [resolvable:$true] %s183_s8 }
  0x15   : > { %p408_p1 = scmp.ge.s32.totalorder %s593_s17, 1  ;;  %p188_p2 = scmp.lt.s32.totalorder %s593_s17, 3 }
  0x16   : > { %s172_s10 = scalar_lea.sflag [#allocation3], %s171_s28  ;;  %p487_p3 = pneg %p693_p0 }
  0x17   : > { %s498_s11 = scalar_lea.vmem %s184_s8, 64  ;;  %s595_s18 = smov [#allocation2]  }
  0x18   : > { %p499_p5 = scmp.ne.s32.totalorder %s184_s8, %s498_s11  ;;  %s503_s19 = sshll.u32 %s595_s18, 4  ;;  %s504_s19 = int_to_ptr.vmem [resolvable:$false] %s503_s19 }
  0x19   : > { %s505_s21 = scalar_lea.vmem %s504_s19, 128  ;;  %p506_p10 = scmp.lt.s32.totalorder %s184_s8, %s504_s19 }
  0x1a   : > { %p501_p6 = pnand %p499_p5, %p487_p3  ;;  %p507_p12 = scmp.lt.s32.totalorder %s505_s21, %s498_s11 }
  0x1c   : > { %p502_p7 = pneg %p501_p6  ;;  %p508_p4 = por %p507_p12, %p506_p10 }
  0x1e   : > { %p509_p13 = pnand %p508_p4, %p502_p7 }
  0x20   : > { %512 = shalt.err (!%p509_p13)
}
  0x21   : > { %422 = dma.hbm_to_vmem [thread:$0]  (!%p693_p0), %s181_s6, 64, %s184_s8, %s172_s10  }
  0x22   : > { %p189_p11 = pnand %p408_p1, %p188_p2 }
  0x23   : > { %s708_s22 = sand.u32 (!%p189_p11), 1, %s577_s13  }
  0x24   : > { %192 = sbr.rel (%p189_p11) target bundleno = 194 (0xc2), region = 32  ;;  %s409_s23 = sshll.u32 (!%p189_p11), %s708_s22, 2 }
  0x25   : > { %s195_s28 = scalar_lea.sflag (!%p189_p11), [#allocation3], %s708_s22  ;;  %s198_s29 = scalar_lea.vmem (!%p189_p11), [#allocation2], %s409_s23 }
  0x29   : > { %564 = dma.done.wait (%p669_p8), %s195_s28, 64  }
  0x2a   : > { %566 = vsyncadd (%p669_p8), %s195_s28, 4294967232  ;;  %v596_v0 = vmov 1   ;;  %v597_v1 = vmov 0   ;;  %v238_v2 = vld [vmem:[%s767_s1] sm:$0xf]  ;;  %s598_s7 = smov 1   ;;  %v240_v6 = vlaneseq }
  0x2b   : > { %483 = vset.pattern.permute.xlu1 %v596_v0  ;;  %482 = vset.pattern.permute.xlu0 %v597_v1  ;;  %v239_v3 = vld [vmem:[%s768_s2] sm:$0xf]  ;;  %v599_v5 = vmov 2   ;;  %s600_s24 = smov 127   ;;  %s412_s8 = sshll.u32 %s585_s15, 6 }
  0x2c   : > { %259 = vperm.xlu1 %483, %v238_v2   ;;  %248 = vperm.xlu0 %482, %v238_v2   ;;  %v237_v4 = vld [vmem:[%s198_s29] sm:$0xf]  ;;  %v241_v7 = vand.u32 127, %v240_v6  ;;  %s228_s9 = scalar_lea.vmem [#allocation5], %s409_s23  ;;  %s288_s19 = scalar_lea.hbm %s769_s3, %s412_s8 }
  0x2d   : > { %s290_s10 = sshll.u32 %s228_s9, 4  ;;  %s276_s21 = scalar_lea.sflag [#allocation4], %s708_s22  ;;  %s291_s10 = int_to_ptr.vmem [resolvable:$true] %s290_s10 }
  0x2e   : > { %vm244_vm0 = vcmp.ge.s32.totalorder %v241_v7, 1  ;;  %vm266_vm1 = vcmp.lt.s32.totalorder %v241_v7, 127  ;;  %s513_s28 = scalar_lea.vmem %s291_s10, 64  ;;  %s601_s29 = smov [#allocation5]  }
  0x2f   : > { %p514_p8 = scmp.ne.s32.totalorder %s291_s10, %s513_s28  ;;  %s517_s15 = sshll.u32 %s601_s29, 4  ;;  %s518_s15 = int_to_ptr.vmem [resolvable:$false] %s517_s15 }
  0x30   : > { %254 = vperm.xlu0 %482, %v239_v3   ;;  %242 = vrot.lane.b32.xlu1 %v237_v4, %s598_s7  ;;  %s519_s23 = scalar_lea.vmem %s518_s15, 128  ;;  %p520_p0 = scmp.lt.s32.totalorder %s291_s10, %s518_s15 }
  0x31   : > { %p515_p11 = pnand %p514_p8, %p673_p9  ;;  %p521_p1 = scmp.lt.s32.totalorder %s519_s23, %s513_s28 }
  0x33   : > { %p516_p12 = pneg %p515_p11  ;;  %p522_p2 = por %p521_p1, %p520_p0 }
  0x34   : > { %484 = vset.pattern.permute.xlu0 %v599_v5  ;;  %264 = vrot.lane.b32.xlu1 %v237_v4, %s600_s24 }
  0x35   : > { %269 = vperm.xlu0 %484, %v238_v2   ;;  %p523_p3 = pnand %p522_p2, %p516_p12 }
  0xa7   : > { %v260_v8 = vpop.permute.xlu1 %259  ;;  %v249_v9 = vpop.permute.xlu0 %248 }
  0xa8   : > { %v262_v14 = vmul.f32 %v260_v8, %v237_v4 }
  0xab   : > { %v255_v10 = vpop.permute.xlu0 %254  ;;  %v243_v11 = vpop.permute.xlu1 %242 }
  0xac   : > { %v245_v12 = vsel %vm244_vm0, %v243_v11, 0.0 }
  0xad   : > { %v251_v13 = vmul.f32 %v249_v9, %v245_v12 }
  0xaf   : > { %v257_v15 = vadd.f32 %v255_v10, %v251_v13  ;;  %v265_v16 = vpop.permute.xlu1 %264 }
  0xb0   : > { %v267_v17 = vsel %vm266_vm1, %v265_v16, 0.0  ;;  %v270_v18 = vpop.permute.xlu0 %269 }
  0xb1   : > { %v263_v19 = vadd.f32 %v262_v14, %v257_v15  ;;  %v272_v20 = vmul.f32 %v270_v18, %v267_v17 }
  0xb3   : > { %v273_v21 = vadd.f32 %v272_v20, %v263_v19 }
  0xb5   : > { %274 = vst [vmem:[%s228_s9] sm:$0xf] %v273_v21 }
  0xb6   : > { %526 = shalt.err (!%p523_p3)
}
  0xb7   : > { %s527_s30 = scalar_lea.hbm %s288_s19, 64  ;;  %s531_s5 = scalar_lea.hbm %s769_s3, 128 }
  0xb8   : > { %p528_p5 = scmp.ne.s32.totalorder %s288_s19, %s527_s30  ;;  %p532_p10 = scmp.lt.s32.totalorder %s288_s19, %s769_s3 }
  0xb9   : > { %p533_p4 = scmp.lt.s32.totalorder %s531_s5, %s527_s30 }
  0xba   : > { %p529_p6 = pnand %p528_p5, %p673_p9 }
  0xbb   : > { %p534_p13 = por %p533_p4, %p532_p10 }
  0xbc   : > { %p530_p7 = pneg %p529_p6 }
  0xbe   : > { %p535_p8 = pnand %p534_p13, %p530_p7 }
  0xc0   : > { %538 = shalt.err (!%p535_p8)
}
  0xc1   : > { %417 = dma.vmem_to_hbm [thread:$0]  (%p673_p9), %s291_s10, 64, %s288_s19, %s276_s21  }
  0xc2 PF: > { %s302_s24 = sand.u32 1, %s573_s12   ;;  %p775_p11 = scmp.ne.s32.totalorder %s773_s27, 0 }
  0xc3   : > { %p776_p12 = scmp.ge.s32.totalorder %s593_s17, 2  ;;  %s303_s8 = scalar_lea.sflag [#allocation4], %s302_s24 }
  0xc5   : > { %p424_p0 = pnand %p776_p12, %p775_p11 }
  0xc7   : > { %p425_p1 = pneg %p424_p0 }
  0xc9   : > { %568 = dma.done.wait (%p425_p1), %s303_s8, 64  }
  0xca   : > { %570 = vsyncadd (%p425_p1), %s303_s8, 4294967232  ;;  %s19_s17 = sadd.s32 1, %s593_s17   ;;  %s777_s12 = smov %s577_s13 }
  0xcb   : > { %p16_p2 = scmp.ge.s32.totalorder %s19_s17, 4   ;;  %s778_s13 = smov %s581_s14 }
  0xcc   : > { %s779_s14 = smov %s678_s26  ;;  %s780_s15 = smov %s589_s16 }
  0xcd   : > { %s781_s16 = smov %s783_s20  ;;  %18 = sbr.rel (!%p16_p2) target bundleno = 6 (0x6), region = 83 }
  0xd2   :  { %308 = vsyncpa [#allocation3], 1 }
  0xd3   :  { %310 = vsyncpa [#allocation3 + $0x1], 1 }
  0xd4   :  { %311 = vsyncpa [#allocation4], 1 }
  0xd5   :  { %313 = vsyncpa [#allocation4 + $0x1], 1 }

</bundles_post_ra>
